<compile_context>
chip_gen: v6e
topology: v6e:2x2x1
jax: 0.10.0
libtpu: 0.0.40
codegen_flags: <defaults>
</compile_context>

<pallas_src>
import math

import jax
import jax.numpy as jnp
from jax.experimental import pallas as pl
from jax.experimental.pallas import tpu as pltpu


_TARGET_BLOCK_BYTES = 8 * 1024 * 1024   # ~8 MiB per x block (v7x-friendly)
_VMEM_LIMIT_BYTES = 48 * 1024 * 1024    # headroom under v7x's 64 MiB physical VMEM


def _sdsd_kernel(x_ref, m_ref, o_ref):
    """o = x * mask with the mask broadcast along the tied axis.

    x_ref : (B, rows, lanes) tile of X
    m_ref : (B, 1, lanes)  for the (B,T,C)/dim=1 layout, or
            (B, rows, 1)   for the (B,C,T)/dim=last layout.
    The mask block index is constant across the inner grid axis, so it stays
    VMEM-resident; the broadcast is a vreg-level sublane/lane broadcast.
    """
    o_ref[...] = (x_ref[...] * m_ref[...]).astype(o_ref.dtype)


def _round_up(n, m):
    return ((n + m - 1) // m) * m


def _divisors(n):
    out = set()
    d = 1
    while d * d <= n:
        if n % d == 0:
            out.add(d)
            out.add(n // d)
        d += 1
    return sorted(out)


def _fold_factor(T, C):
    """Smallest divisor k of T so that k*C is a multiple of 128 (lane-dense),
    falling back to k*C >= 128, then to the largest divisor of T."""
    if C % 128 == 0 or T <= 1:
        return 1
    k0 = 128 // math.gcd(C, 128)
    if T % k0 == 0:
        return k0
    divs = [d for d in _divisors(T) if d > 1]
    mult128 = [d for d in divs if (d * C) % 128 == 0]
    if mult128:
        return mult128[0]
    ge128 = [d for d in divs if d * C >= 128]
    if ge128:
        return ge128[0]
    return divs[-1] if divs else 1


def shared_dim_scale_dropout(x, *, key=None, seed=0, alpha=0.5, dim=1,
                             training=True, block_t=None):
    """Pallas implementation of SharedDimScaleDropout.forward for 3-D inputs.

    Supported layouts:
      * (B, T, C) with dim=1        (mask tied / constant across T)
      * (B, C, T) with dim=2 or -1  (mask tied across the last axis)

    block_t: optional override of the tiled row-axis block size (the reshaped
             T axis for dim=1, the C axis for dim=last); rounded to the
             sublane granularity of x.dtype.
    """
    if alpha > 0.5 or alpha < 0.0:
        raise ValueError("alpha must be between 0 and 0.5")
    if not training or alpha == 0.0:
        return x
    if x.ndim != 3 or (dim % x.ndim) not in (1, 2):
        # TODO(synk): other ranks / tied axes (e.g. dim=0) are not implemented.
        raise NotImplementedError("kernel implements 3-D input with dim in {1, 2, -1}")
    dim = dim % x.ndim

    itemsize = x.dtype.itemsize
    sublane = max(8, 32 // itemsize)          # 8 (f32) / 16 (bf16) / 32 (int8)

    # ---- tied mask: drawn once host-side, multiplied in x.dtype -------------
    if key is None:
        key = jax.random.PRNGKey(seed)
    mask_shape = tuple(s for i, s in enumerate(x.shape) if i != dim)   # (B, C)
    mask = jax.random.uniform(key, mask_shape, jnp.float32,
                              minval=1.0 - 2.0 * alpha,
                              maxval=1.0 + 2.0 * alpha).astype(x.dtype)

    if dim == 1:
        # ------------------ (B, T, C), mask constant across T ----------------
        B, T, C = x.shape

        # Lane-density fold: (B, T, C) -> (B, T//k, k*C); exact because the
        # mask is constant along T.  Free reshape (contiguous, row-major).
        k = _fold_factor(T, C)
        Tr, Cf = T // k, k * C
        xr = x.reshape(B, Tr, Cf)
        mr = jnp.tile(mask, (1, k)).reshape(B, 1, Cf)

        # Lane (C) tile: full Cf unless a minimal-height full-Cf block exceeds
        # the block target (wide B*C shapes) and Cf is 128-tileable.
        if Cf % 128 != 0 or B * Cf * itemsize * sublane <= _TARGET_BLOCK_BYTES:
            tile_c = Cf
        else:
            lanes = _TARGET_BLOCK_BYTES // (B * sublane * itemsize)
            tile_c = min(Cf, max(512, (lanes // 128) * 128))
        num_c = pl.cdiv(Cf, tile_c)

        # Row (T) tile: ~8 MiB per block, sublane granular, ragged tail OK.
        if block_t is not None:
            tile_t = min(Tr, max(sublane, _round_up(int(block_t), sublane)))
        else:
            denom = max(1, B * tile_c * itemsize)
            tile_t = max(sublane,
                         (_TARGET_BLOCK_BYTES // denom) // sublane * sublane)
            if tile_t >= Tr:
                tile_t = Tr
                # Guarantee >= 2 grid steps so the "parallel" axes can shard
                # across both v7x TensorCores (neutral on v5e/v6e).
                if Tr > sublane and num_c == 1:
                    tile_t = min(Tr, max(sublane,
                                         _round_up((Tr + 1) // 2, sublane)))

        grid = (num_c, pl.cdiv(Tr, tile_t))   # inner axis = rows -> mask resident
        x_spec = pl.BlockSpec((B, tile_t, tile_c), lambda c, t: (0, t, c))
        m_spec = pl.BlockSpec((B, 1, tile_c), lambda c, t: (0, 0, c))
        out_shape = jax.ShapeDtypeStruct((B, Tr, Cf), x.dtype)
        operands = (xr, mr)
        unfold = lambda o: o.reshape(B, T, C)
    else:
        # ------------- (B, C, T), mask constant across the last axis ---------
        B, C, T = x.shape
        mr = mask.reshape(B, C, 1)

        # Lane (T) tile: full T unless a minimal-height block over full T
        # exceeds the block target and T is 128-tileable.
        if T % 128 != 0 or B * T * itemsize * sublane <= _TARGET_BLOCK_BYTES:
            tile_t = T
        else:
            lanes = _TARGET_BLOCK_BYTES // (B * sublane * itemsize)
            tile_t = min(T, max(512, (lanes // 128) * 128))
        num_t = pl.cdiv(T, tile_t)

        # Row (C) tile.
        if block_t is not None:
            tile_c = min(C, max(sublane, _round_up(int(block_t), sublane)))
        else:
            denom = max(1, B * tile_t * itemsize)
            tile_c = max(sublane,
                         (_TARGET_BLOCK_BYTES // denom) // sublane * sublane)
            if tile_c >= C:
                tile_c = C
                if C > sublane and num_t == 1:
                    tile_c = min(C, max(sublane,
                                        _round_up((C + 1) // 2, sublane)))

        grid = (pl.cdiv(C, tile_c), num_t)    # inner axis = T -> mask resident
        x_spec = pl.BlockSpec((B, tile_c, tile_t), lambda c, t: (0, c, t))
        m_spec = pl.BlockSpec((B, tile_c, 1), lambda c, t: (0, c, 0))
        out_shape = jax.ShapeDtypeStruct((B, C, T), x.dtype)
        operands = (x, mr)
        unfold = lambda o: o

    out = pl.pallas_call(
        _sdsd_kernel,
        out_shape=out_shape,
        grid=grid,
        in_specs=[x_spec, m_spec],
        out_specs=x_spec,
        compiler_params=pltpu.CompilerParams(
            dimension_semantics=("parallel", "parallel"),
            vmem_limit_bytes=_VMEM_LIMIT_BYTES,
        ),
    )(*operands)
    return unfold(out)


if __name__ == "__main__":
    root = jax.random.PRNGKey(0)
    alpha = 0.5
    lo, hi = 1.0 - 2.0 * alpha, 1.0 + 2.0 * alpha
    kx, km, kx2, km2 = jax.random.split(root, 4)

    # --- primary case: (B, T, C) = (2, 8, 32), dim=1 (mask tied across T) ----
    B, T, C = 2, 8, 32
    x = jax.random.uniform(kx, (B, T, C), jnp.float32, minval=0.5, maxval=1.5)
    out = jax.block_until_ready(
        shared_dim_scale_dropout(x, key=km, alpha=alpha, dim=1, training=True))

    mask_ref = jax.random.uniform(km, (B, C), jnp.float32, minval=lo, maxval=hi)
    ref = x * mask_ref[:, None, :]
    assert bool(jnp.allclose(out, ref, rtol=1e-6, atol=1e-6)), "mismatch vs reference"

    ratio = out / x
    assert float(jnp.max(jnp.abs(ratio - ratio[:, :1, :]))) < 1e-5, \
        "mask not tied across dim=1"
    assert bool(jnp.all((ratio >= lo - 1e-5) & (ratio <= hi + 1e-5))), \
        "mask values outside [1 - 2*alpha, 1 + 2*alpha]"

    # eval mode must be identity
    eval_out = shared_dim_scale_dropout(x, key=km, alpha=alpha, training=False)
    assert bool(jnp.all(eval_out == x)), "eval mode must be identity"

    # --- multi-tile grid: several row tiles must share the resident mask -----
    T2 = 256
    x2 = jax.random.uniform(kx2, (B, T2, C), jnp.float32, minval=0.5, maxval=1.5)
    out2 = jax.block_until_ready(
        shared_dim_scale_dropout(x2, key=km, alpha=alpha, dim=1, block_t=16))
    ref2 = x2 * mask_ref[:, None, :]
    assert bool(jnp.allclose(out2, ref2, rtol=1e-6, atol=1e-6)), "multi-tile mismatch"

    # --- un-foldable C (no divisor of T makes k*C a multiple of 128) ---------
    T3, C3 = 10, 48
    x3 = jax.random.uniform(kx2, (B, T3, C3), jnp.float32, minval=0.5, maxval=1.5)
    out3 = jax.block_until_ready(
        shared_dim_scale_dropout(x3, key=km2, alpha=alpha, dim=1))
    m3 = jax.random.uniform(km2, (B, C3), jnp.float32, minval=lo, maxval=hi)
    assert bool(jnp.allclose(out3, x3 * m3[:, None, :], rtol=1e-6, atol=1e-6)), \
        "fallback-fold mismatch"

    # --- dim=-1 path: (B, C, T), tied axis on lanes ---------------------------
    C4, T4 = 40, 256
    x4 = jax.random.uniform(kx, (B, C4, T4), jnp.float32, minval=0.5, maxval=1.5)
    out4 = jax.block_until_ready(
        shared_dim_scale_dropout(x4, key=km2, alpha=alpha, dim=-1))
    m4 = jax.random.uniform(km2, (B, C4), jnp.float32, minval=lo, maxval=hi)
    assert bool(jnp.allclose(out4, x4 * m4[:, :, None], rtol=1e-6, atol=1e-6)), \
        "dim=-1 mismatch"

    print("KERNEL_OK")
</pallas_src>

<mosaic_0001>
module attributes {stable_mosaic.version = 11 : i64} {
  func.func @_sdsd_kernel(%arg0: i32, %arg1: i32, %arg2: memref<2x2x128xf32, #tpu.memory_space<vmem>>, %arg3: memref<2x1x128xf32, #tpu.memory_space<vmem>>, %arg4: memref<2x2x128xf32, #tpu.memory_space<vmem>>) attributes {dimension_semantics = [#tpu.dimension_semantics<parallel>, #tpu.dimension_semantics<parallel>], iteration_bounds = array<i64: 1, 1>, scalar_prefetch = 0 : i64, scratch_operands = 0 : i64, tpu.core_type = #tpu.core_type<tc>, window_params = [{transform_indices = @transform_0, window_bounds = array<i64: 2, 2, 128>}, {transform_indices = @transform_1, window_bounds = array<i64: 2, 1, 128>}, {transform_indices = @transform_2, window_bounds = array<i64: 2, 2, 128>}]} {
    %c0 = arith.constant 0 : index
    %c0_0 = arith.constant 0 : index
    %c0_1 = arith.constant 0 : index
    %0 = vector.load %arg2[%c0, %c0_0, %c0_1] : memref<2x2x128xf32, #tpu.memory_space<vmem>>, vector<2x2x128xf32>
    %c0_2 = arith.constant 0 : index
    %c0_3 = arith.constant 0 : index
    %c0_4 = arith.constant 0 : index
    %1 = vector.load %arg3[%c0_2, %c0_3, %c0_4] : memref<2x1x128xf32, #tpu.memory_space<vmem>>, vector<2x1x128xf32>
    %2 = vector.broadcast %1 : vector<2x1x128xf32> to vector<2x2x128xf32>
    %3 = arith.mulf %0, %2 : vector<2x2x128xf32>
    %c0_5 = arith.constant 0 : index
    %c0_6 = arith.constant 0 : index
    %c0_7 = arith.constant 0 : index
    %4 = vector.load %arg4[%c0_5, %c0_6, %c0_7] : memref<2x2x128xf32, #tpu.memory_space<vmem>>, vector<2x2x128xf32>
    tpu.vector_store %arg4[%c0_5, %c0_6, %c0_7], %3 {strides = array<i32>} : memref<2x2x128xf32, #tpu.memory_space<vmem>>, vector<2x2x128xf32>,
    return
  }
  func.func @transform_0(%arg0: i32, %arg1: i32) -> (i32, i32, i32) {
    %c0_i32 = arith.constant 0 : i32
    %c0_i32_0 = arith.constant 0 : i32
    return %c0_i32, %arg1, %arg0 : i32, i32, i32
  }
  func.func @transform_1(%arg0: i32, %arg1: i32) -> (i32, i32, i32) {
    %c0_i32 = arith.constant 0 : i32
    %c0_i32_0 = arith.constant 0 : i32
    %c0_i32_1 = arith.constant 0 : i32
    return %c0_i32, %c0_i32_0, %arg0 : i32, i32, i32
  }
  func.func @transform_2(%arg0: i32, %arg1: i32) -> (i32, i32, i32) {
    %c0_i32 = arith.constant 0 : i32
    %c0_i32_0 = arith.constant 0 : i32
    return %c0_i32, %arg1, %arg0 : i32, i32, i32
  }
}

</mosaic_0001>

<bundles_post_ra>
// kernel: tpu_custom_call.1
= control target key start
LH: loop header
LB: loop body
LE: loop exit
PB: predicated region body
PF: predicated region fallthrough
CT: control target
= control target key end

     0   :  { %7 = vsyncpa [#allocation3], 0  ;;  %s190_s0 = inlined_call_operand.hbm [shape: f32[2,2,128], index: 0, kind: input, shape index: {}]   ;;  %s191_s1 = inlined_call_operand.hbm [shape: f32[2,1,128], index: 1, kind: input, shape index: {}]   ;;  %s192_s2 = inlined_call_operand.hbm [shape: f32[2,2,128], index: 2, kind: output, shape index: {}]  }
   0x1   :  { %8 = vsyncpa [#allocation6], 0 }
   0x2   :  { %9 = vsyncpa [#allocation4], 0  ;;  %s153_s9 = smov [#allocation2]  }
   0x3   :  { %s15_s10 = sshll.u32 %s153_s9, 4  ;;  %s16_s10 = int_to_ptr.vmem [resolvable:$true] %s15_s10 }
   0x4   :  { %s95_s11 = scalar_lea.vmem %s16_s10, 64  ;;  %p100_p1 = scmp.lt.s32.totalorder %s16_s10, %s16_s10 }
   0x5   :  { %p96_p0 = scmp.ne.s32.totalorder %s16_s10, %s95_s11  ;;  %p101_p2 = scmp.lt.s32.totalorder %s95_s11, %s95_s11 }
   0x7   :  { %p102_p3 = por %p101_p2, %p100_p1 }
   0x9   :  { %p103_p4 = pnand %p102_p3, %p96_p0 }
   0xb   :  { %106 = shalt.err (!%p103_p4)
}
   0xc   :  { %s154_s12 = smov 32   ;;  %s155_s13 = smov 2  }
   0xd   :  { %21 = dma.hbm_to_vmem [thread:$0]  %s190_s0, 64, %s16_s10, [#allocation3], %s154_s12, %s154_s12, %s155_s13  }
   0xe   :  { %s156_s16 = smov [#allocation5]  }
   0xf   :  { %s27_s17 = sshll.u32 %s156_s16, 4  ;;  %s28_s17 = int_to_ptr.vmem [resolvable:$true] %s27_s17 }
  0x10   :  { %s115_s18 = scalar_lea.vmem %s28_s17, 32  ;;  %p120_p6 = scmp.lt.s32.totalorder %s28_s17, %s28_s17 }
  0x11   :  { %p116_p5 = scmp.ne.s32.totalorder %s28_s17, %s115_s18  ;;  %p121_p7 = scmp.lt.s32.totalorder %s115_s18, %s115_s18 }
  0x13   :  { %p122_p8 = por %p121_p7, %p120_p6 }
  0x15   :  { %p123_p9 = pnand %p122_p8, %p116_p5 }
  0x17   :  { %126 = shalt.err (!%p123_p9)
}
  0x18   :  { %s157_s19 = smov 16   ;;  %s158_s20 = smov 1  }
  0x19   :  { %33 = dma.hbm_to_vmem [thread:$0]  %s191_s1, 32, %s28_s17, [#allocation6], %s157_s19, %s157_s19, %s158_s20  }
  0x1a   :  { %147 = dma.done.wait [#allocation3], 64  }
  0x1b   :  { %148 = vsyncadd [#allocation3], 4294967232 }
  0x1c   :  { %149 = dma.done.wait [#allocation6], 32  }
  0x1d   :  { %150 = vsyncadd [#allocation6], 4294967264  ;;  %s159_s0 = smov [#allocation7]   ;;  %v40_v0 = vld [vmem:[#allocation2] sm:$0x3] }
  0x1e   :  { %s65_s23 = sshll.u32 %s159_s0, 4  ;;  %v78_v1 = vld [vmem:[#allocation5] ss:$0 sm:$0xff]  ;;  %v41_v2 = vld [vmem:[#allocation2 + $0x2] sm:$0x3]  ;;  %s66_s23 = int_to_ptr.vmem [resolvable:$true] %s65_s23 }
  0x1f   :  { %v56_v3 = vmul.f32 %v78_v1, %v40_v0  ;;  %v79_v4 = vld [vmem:[#allocation5 + $0x1] ss:$0 sm:$0xff]  ;;  %s127_s24 = scalar_lea.vmem %s66_s23, 64  ;;  %p132_p11 = scmp.lt.s32.totalorder %s66_s23, %s66_s23 }
  0x20   :  { %v57_v5 = vmul.f32 %v79_v4, %v41_v2  ;;  %p128_p10 = scmp.ne.s32.totalorder %s66_s23, %s127_s24  ;;  %p133_p12 = scmp.lt.s32.totalorder %s127_s24, %s127_s24 }
  0x21   :  { %58 = vst [vmem:[#allocation7] sm:$0x3] %v56_v3 }
  0x22   :  { %59 = vst [vmem:[#allocation7 + $0x2] sm:$0x3] %v57_v5  ;;  %p134_p13 = por %p133_p12, %p132_p11 }
  0x24   :  { %p135_p0 = pnand %p134_p13, %p128_p10 }
  0x26   :  { %138 = shalt.err (!%p135_p0)
}
  0x27   :  { %71 = dma.vmem_to_hbm [thread:$0]  %s66_s23, 64, %s192_s2, [#allocation4], %s154_s12, %s154_s12, %s155_s13  }
  0x28   :  { %151 = dma.done.wait [#allocation4], 64  }
  0x29   :  { %152 = vsyncadd [#allocation4], 4294967232 }
  0x2a   :  { %75 = vsyncpa [#allocation3], 1 }
  0x2b   :  { %76 = vsyncpa [#allocation6], 1 }
  0x2c   :  { %77 = vsyncpa [#allocation4], 1 }

</bundles_post_ra>
